<compile_context>
chip_gen: v7x
topology: tpu7x:2x2x1
jax: 0.10.0
libtpu: 0.0.40
codegen_flags: <defaults>
</compile_context>

<pallas_src>
import functools

import jax
import jax.numpy as jnp
from jax.experimental import pallas as pl
from jax.experimental.pallas import tpu as pltpu


# ---------------------------------------------------------------------------
# Shared per-tile math.
# ---------------------------------------------------------------------------
def _apply_jitter(f, j, mask, scale_over_c, out_dtype):
    """f: (C,T) feature tile, j: (C,T) raw gaussian, mask: (1,T) bool."""
    f32 = f.astype(jnp.float32)
    j32 = j.astype(jnp.float32)
    f_sumsq = jnp.sum(f32 * f32, axis=0, keepdims=True)          # (1, T)
    j_sumsq = jnp.sum(j32 * j32, axis=0, keepdims=True)          # (1, T)
    # rsqrt(max(ss, 1e-24)) == 1 / max(||j||, 1e-12)  (torch F.normalize clamp)
    inv_j_norm = jax.lax.rsqrt(jnp.maximum(j_sumsq, 1e-24))      # EUP
    factor = jnp.where(mask,
                       jnp.sqrt(f_sumsq) * inv_j_norm * scale_over_c,
                       0.0)                                      # (1, T)
    # Hot path: one broadcast multiply + one add per element.
    return (f32 + j32 * factor).astype(out_dtype)


# ---------------------------------------------------------------------------
# TPU-only kernel: all randomness from the on-chip PRNG (no extra HBM traffic).
# ---------------------------------------------------------------------------
def _uniform01(shape):
    """Uniform [0, 1) float32 from the in-kernel hardware PRNG."""
    bits = pltpu.prng_random_bits(shape)
    if bits.dtype != jnp.uint32:
        bits = pltpu.bitcast(bits, jnp.uint32)
    fbits = (bits >> 9) | jnp.uint32(0x3F800000)     # exponent for [1, 2)
    return pltpu.bitcast(fbits, jnp.float32) - 1.0


def _jitter_kernel_tpu(scale_over_c, p_threshold, seed_ref, f_ref, o_ref):
    b = pl.program_id(0)
    s = pl.program_id(1)
    # Independent seed words (seed, batch, tile) -> decorrelated per-tile streams.
    pltpu.prng_seed(seed_ref[0], b, s)

    c_dim, t_dim = f_ref.shape
    half = (c_dim + 1) // 2

    # Box-Muller using BOTH branches: ~0.5 log/sqrt and 1 uniform per element.
    u1 = _uniform01((half, t_dim))
    u2 = _uniform01((half, t_dim))
    r = jnp.sqrt(-2.0 * jnp.log(1.0 - u1))           # 1-u1 in [2^-23, 1] -> finite
    theta = (2.0 * jnp.pi) * u2
    j = jnp.concatenate([r * jnp.cos(theta), r * jnp.sin(theta)], axis=0)
    j = j[:c_dim]                                    # (C, T) ~ N(0, 1)

    # Bernoulli(p) mask straight from raw uint32 bits: one integer compare.
    mbits = pltpu.prng_random_bits((1, t_dim))
    if mbits.dtype != jnp.uint32:
        mbits = pltpu.bitcast(mbits, jnp.uint32)
    mask = mbits < jnp.uint32(p_threshold)

    o_ref[...] = _apply_jitter(f_ref[...], j, mask, scale_over_c, o_ref.dtype)


# ---------------------------------------------------------------------------
# Portable kernel: gaussian jitter + mask uniform are generated with jax.random
# outside and streamed in (used on CPU / interpret backends).
# ---------------------------------------------------------------------------
def _jitter_kernel_hostrng(scale_over_c, p, f_ref, j_ref, u_ref, o_ref):
    mask = u_ref[...] < p                            # (1, T)
    o_ref[...] = _apply_jitter(f_ref[...], j_ref[...], mask, scale_over_c,
                               o_ref.dtype)


# ---------------------------------------------------------------------------
# Wrapper.
# ---------------------------------------------------------------------------
def _pick_tile_hw(hw, c, itemsize):
    """Lane-dense spatial tile: ~1 MiB of feature bytes per tile, multiple of
    128 (or the full extent).  Keeps f32 intermediates + double-buffered I/O
    well inside v5e's 16 MiB scoped default and v7x's 64 MiB physical VMEM,
    while giving small-C features big enough tiles to amortize grid-step cost."""
    target_bytes = 1 << 20
    t = (target_bytes // max(c * itemsize, 1)) // 128 * 128
    t = max(128, min(t, 2048))
    if hw <= t:
        return hw                  # single full-extent block (any size allowed)
    return t


def feature_jitter(x, seed=0, *, scale=1.0, p=0.25, training=True,
                   block_hw=None, use_tpu_prng=None):
    """JAX/Pallas equivalent of FeatureJitter.forward (NCHW input)."""
    if (not training) or scale <= 0:
        return x

    B, C, H, W = x.shape
    HW = H * W
    scale_over_c = float(scale) / C

    t_hw = block_hw if block_hw is not None else _pick_tile_hw(
        HW, C, x.dtype.itemsize)
    # Ragged last block: no host-side pad / slice, OOB columns are independent
    # and their writes are discarded.
    grid = (B, pl.cdiv(HW, t_hw))
    xf = x.reshape(B, C, HW)          # trailing-dim merge: free

    out_shape = jax.ShapeDtypeStruct((B, C, HW), x.dtype)
    cparams = pltpu.CompilerParams(
        dimension_semantics=("parallel", "parallel"),
        vmem_limit_bytes=32 * 1024 * 1024)

    if use_tpu_prng is None:
        use_tpu_prng = jax.default_backend() == "tpu"

    if use_tpu_prng:
        try:
            threshold = min(max(int(p * (1 << 32)), 0), (1 << 32) - 1)
            seed_arr = jnp.asarray([seed], dtype=jnp.int32)
            out = pl.pallas_call(
                functools.partial(_jitter_kernel_tpu, scale_over_c, threshold),
                out_shape=out_shape,
                grid_spec=pltpu.PrefetchScalarGridSpec(
                    num_scalar_prefetch=1,          # seed lives in SMEM
                    grid=grid,
                    in_specs=[pl.BlockSpec((None, C, t_hw),
                                           lambda b, s, sref: (b, 0, s))],
                    out_specs=pl.BlockSpec((None, C, t_hw),
                                           lambda b, s, sref: (b, 0, s)),
                ),
                compiler_params=cparams,
            )(seed_arr, xf)
            return out.reshape(B, C, H, W)
        except Exception:
            # On-chip PRNG unavailable (e.g. interpret / non-TPU lowering):
            # fall through to the portable host-RNG kernel below.
            pass

    kj, km = jax.random.split(jax.random.PRNGKey(seed))
    j_raw = jax.random.normal(kj, (B, C, HW), dtype=jnp.float32)
    u_mask = jax.random.uniform(km, (B, 1, HW), dtype=jnp.float32)
    out = pl.pallas_call(
        functools.partial(_jitter_kernel_hostrng, scale_over_c, float(p)),
        out_shape=out_shape,
        grid_spec=pl.GridSpec(
            grid=grid,
            in_specs=[
                pl.BlockSpec((None, C, t_hw), lambda b, s: (b, 0, s)),
                pl.BlockSpec((None, C, t_hw), lambda b, s: (b, 0, s)),
                pl.BlockSpec((None, 1, t_hw), lambda b, s: (b, 0, s)),
            ],
            out_specs=pl.BlockSpec((None, C, t_hw), lambda b, s: (b, 0, s)),
        ),
        compiler_params=cparams,
    )(xf, j_raw, u_mask)
    return out.reshape(B, C, H, W)


# ---------------------------------------------------------------------------
# Correctness: exact per-pixel invariants of the op, independent of RNG stream.
# ---------------------------------------------------------------------------
def _check_semantics(x, out, *, scale, p, atol=1e-5, rtol=1e-3):
    B, C, H, W = x.shape
    xf = x.reshape(B, C, H * W).astype(jnp.float32)
    of = out.reshape(B, C, H * W).astype(jnp.float32)
    delta = of - xf
    dn = jnp.sqrt(jnp.sum(delta * delta, axis=1))                   # (B, HW)
    expected = jnp.sqrt(jnp.sum(xf * xf, axis=1)) / C * scale       # (B, HW)
    zero_ok = dn <= atol                                            # mask off
    full_ok = jnp.abs(dn - expected) <= (atol + rtol * expected)    # mask on
    assert bool(jnp.all(zero_ok | full_ok)), "per-pixel jitter norm mismatch"
    frac = float(jnp.mean((full_ok & ~zero_ok).astype(jnp.float32)))
    assert 0.05 < frac < 0.6, f"mask fraction {frac} implausible for p={p}"


if __name__ == "__main__":
    key = jax.random.PRNGKey(0)
    B, C, H, W = 2, 4, 16, 16
    x = jax.random.normal(key, (B, C, H, W), dtype=jnp.float32)

    out = feature_jitter(x, seed=1234, scale=1.0, p=0.25, training=True)
    out = jax.block_until_ready(out)
    assert out.shape == x.shape and out.dtype == x.dtype
    _check_semantics(x, out, scale=1.0, p=0.25)

    # eval mode / scale <= 0 are identity
    assert jnp.array_equal(feature_jitter(x, seed=1234, training=False), x)
    assert jnp.array_equal(feature_jitter(x, seed=1234, scale=0.0), x)

    # Non-128-multiple spatial size exercises the ragged / full-extent block path.
    x2 = jax.random.normal(jax.random.PRNGKey(1), (2, 8, 14, 14), dtype=jnp.float32)
    out2 = jax.block_until_ready(feature_jitter(x2, seed=7, scale=2.0, p=0.25))
    assert out2.shape == x2.shape
    _check_semantics(x2, out2, scale=2.0, p=0.25)

    # TODO(synk): bit-exact reproduction of torch's randn/rand stream is not
    # possible; invariants above verify the op's semantics instead.
    print("KERNEL_OK")
</pallas_src>

<mosaic_0001>
module attributes {stable_mosaic.version = 11 : i64} {
  func.func @_jitter_kernel_hostrng(%arg0: i32, %arg1: i32, %arg2: memref<1x4x256xf32, #tpu.memory_space<vmem>>, %arg3: memref<1x4x256xf32, #tpu.memory_space<vmem>>, %arg4: memref<1x1x256xf32, #tpu.memory_space<vmem>>, %arg5: memref<1x4x256xf32, #tpu.memory_space<vmem>>) attributes {dimension_semantics = [#tpu.dimension_semantics<parallel>, #tpu.dimension_semantics<parallel>], iteration_bounds = array<i64: 2, 1>, scalar_prefetch = 0 : i64, scratch_operands = 0 : i64, tpu.core_type = #tpu.core_type<tc>, window_params = [{transform_indices = @transform_0, window_bounds = array<i64: 1, 4, 256>}, {transform_indices = @transform_1, window_bounds = array<i64: 1, 4, 256>}, {transform_indices = @transform_2, window_bounds = array<i64: 1, 1, 256>}, {transform_indices = @transform_3, window_bounds = array<i64: 1, 4, 256>}]} {
    %c0 = arith.constant 0 : index
    %c0_0 = arith.constant 0 : index
    %c0_1 = arith.constant 0 : index
    %0 = vector.load %arg4[%c0, %c0_0, %c0_1] : memref<1x1x256xf32, #tpu.memory_space<vmem>>, vector<1x1x256xf32>
    %1 = vector.shape_cast %0 : vector<1x1x256xf32> to vector<1x256xf32>
    %cst = arith.constant 2.500000e-01 : f32
    %2 = vector.broadcast %cst : f32 to vector<1x256xf32>
    %3 = arith.cmpf olt, %1, %2 : vector<1x256xf32>
    %c0_2 = arith.constant 0 : index
    %c0_3 = arith.constant 0 : index
    %c0_4 = arith.constant 0 : index
    %4 = vector.load %arg2[%c0_2, %c0_3, %c0_4] : memref<1x4x256xf32, #tpu.memory_space<vmem>>, vector<1x4x256xf32>
    %5 = vector.shape_cast %4 : vector<1x4x256xf32> to vector<4x256xf32>
    %c0_5 = arith.constant 0 : index
    %c0_6 = arith.constant 0 : index
    %c0_7 = arith.constant 0 : index
    %6 = vector.load %arg3[%c0_5, %c0_6, %c0_7] : memref<1x4x256xf32, #tpu.memory_space<vmem>>, vector<1x4x256xf32>
    %7 = vector.shape_cast %6 : vector<1x4x256xf32> to vector<4x256xf32>
    %8 = arith.mulf %5, %5 : vector<4x256xf32>
    %cst_8 = arith.constant dense<0.000000e+00> : vector<256xf32>
    %9 = vector.multi_reduction <add>, %8, %cst_8 [0] : vector<4x256xf32> to vector<256xf32>
    %10 = vector.shape_cast %9 : vector<256xf32> to vector<1x256xf32>
    %11 = arith.mulf %7, %7 : vector<4x256xf32>
    %cst_9 = arith.constant dense<0.000000e+00> : vector<256xf32>
    %12 = vector.multi_reduction <add>, %11, %cst_9 [0] : vector<4x256xf32> to vector<256xf32>
    %13 = vector.shape_cast %12 : vector<256xf32> to vector<1x256xf32>
    %cst_10 = arith.constant 1.000000e-24 : f32
    %14 = vector.broadcast %cst_10 : f32 to vector<1x256xf32>
    %15 = arith.maximumf %13, %14 : vector<1x256xf32>
    %16 = math.rsqrt %15 : vector<1x256xf32>
    %17 = math.sqrt %10 : vector<1x256xf32>
    %18 = arith.mulf %17, %16 : vector<1x256xf32>
    %cst_11 = arith.constant 2.500000e-01 : f32
    %19 = vector.broadcast %cst_11 : f32 to vector<1x256xf32>
    %20 = arith.mulf %18, %19 : vector<1x256xf32>
    %cst_12 = arith.constant 0.000000e+00 : f32
    %21 = vector.broadcast %cst_12 : f32 to vector<1x256xf32>
    %22 = arith.select %3, %20, %21 : vector<1x256xi1>, vector<1x256xf32>
    %23 = vector.broadcast %22 : vector<1x256xf32> to vector<4x256xf32>
    %24 = arith.mulf %7, %23 : vector<4x256xf32>
    %25 = arith.addf %5, %24 : vector<4x256xf32>
    %c0_13 = arith.constant 0 : index
    %c0_14 = arith.constant 0 : index
    %c0_15 = arith.constant 0 : index
    %26 = vector.load %arg5[%c0_13, %c0_14, %c0_15] : memref<1x4x256xf32, #tpu.memory_space<vmem>>, vector<1x4x256xf32>
    %27 = vector.shape_cast %26 : vector<1x4x256xf32> to vector<4x256xf32>
    %28 = vector.shape_cast %25 : vector<4x256xf32> to vector<1x4x256xf32>
    tpu.vector_store %arg5[%c0_13, %c0_14, %c0_15], %28 {strides = array<i32>} : memref<1x4x256xf32, #tpu.memory_space<vmem>>, vector<1x4x256xf32>,
    return
  }
  func.func @transform_0(%arg0: i32, %arg1: i32) -> (i32, i32, i32) {
    %c0_i32 = arith.constant 0 : i32
    %c0_i32_0 = arith.constant 0 : i32
    return %arg0, %c0_i32, %arg1 : i32, i32, i32
  }
  func.func @transform_1(%arg0: i32, %arg1: i32) -> (i32, i32, i32) {
    %c0_i32 = arith.constant 0 : i32
    %c0_i32_0 = arith.constant 0 : i32
    return %arg0, %c0_i32, %arg1 : i32, i32, i32
  }
  func.func @transform_2(%arg0: i32, %arg1: i32) -> (i32, i32, i32) {
    %c0_i32 = arith.constant 0 : i32
    %c0_i32_0 = arith.constant 0 : i32
    return %arg0, %c0_i32, %arg1 : i32, i32, i32
  }
  func.func @transform_3(%arg0: i32, %arg1: i32) -> (i32, i32, i32) {
    %c0_i32 = arith.constant 0 : i32
    %c0_i32_0 = arith.constant 0 : i32
    return %arg0, %c0_i32, %arg1 : i32, i32, i32
  }
}

</mosaic_0001>

<bundles_post_ra>
// kernel: tpu_custom_call.1
= control target key start
LH: loop header
LB: loop body
LE: loop exit
PB: predicated region body
PF: predicated region fallthrough
CT: control target
= control target key end

     0   :  { %8 = vsyncpa [#allocation3], 0  ;;  %s1032_s0 = inlined_call_operand.hbm [shape: f32[2,4,256], index: 0, kind: input, shape index: {}]   ;;  %s1033_s1 = inlined_call_operand.hbm [shape: f32[2,4,256], index: 1, kind: input, shape index: {}]   ;;  %s1034_s2 = inlined_call_operand.vmem [shape: f32[2,1,256], index: 2, kind: input, shape index: {}]   ;;  %s1035_s3 = inlined_call_operand.hbm [shape: f32[2,4,256], index: 3, kind: output, shape index: {}]  }
   0x1   :  { %10 = vsyncpa [#allocation3 + $0x1], 0 }
   0x2   :  { %11 = vsyncpa [#allocation6], 0 }
   0x3   :  { %13 = vsyncpa [#allocation6 + $0x1], 0 }
   0x4   :  { %14 = vsyncpa [#allocation4], 0 }
   0x5   :  { %16 = vsyncpa [#allocation4 + $0x1], 0  ;;  %s792_s12 = smov 0   ;;  %s794_s13 = smov 0  }
   0x6   :  { %s796_s14 = smov 0   ;;  %s798_s15 = smov 0  }
   0x7   :  { %s800_s16 = smov 0   ;;  %s802_s17 = smov 0  }
   0x8 LB: > { %s521_s18 = sadd.s32 4294967295, %s766_s17   ;;  %s522_s19 = sadd.s32 4294967294, %s766_s17   ;;  %s766_s17 = sphi %s802_s17, %s22_s17   ;;  %s762_s16 = sphi %s800_s16, %s1055_s16   ;;  %s758_s15 = sphi %s798_s15, %s1054_s15   ;;  %s754_s14 = sphi %s796_s14, %s1053_s14   ;;  %s750_s13 = sphi %s794_s13, %s1052_s13   ;;  %s746_s12 = sphi %s792_s12, %s1051_s12  }
   0x9   : > { %s34_s20 = sadd.s32 1, %s762_s16  ;;  %s43_s21 = sadd.s32 1, %s754_s14 }
   0xa   : > { %p36_p0 = scmp.ge.s32.totalorder %s34_s20, 2  ;;  %p50_p1 = scmp.ne.s32.totalorder %s754_s14, %s750_s13 }
   0xb   : > { %p51_p2 = scmp.eq.s32.totalorder %s766_s17, 0  ;;  %p56_p3 = scmp.ne.s32.totalorder %s750_s13, %s746_s12 }
   0xc   : > { %s1057_s20 = smov (%p36_p0, %s34_s20), 0  ;;  %p57_p5 = scmp.eq.s32.totalorder %s521_s18, 0 }
   0xd   : > { %p833_p4 = por %p51_p2, %p50_p1  ;;  %s38_s23 = ssub.s32 %s762_s16, %s1057_s20 }
   0xe   : > { %p138_p6 = scmp.eq.s32.totalorder %s521_s18, 1  ;;  %p41_p7 = scmp.eq.s32.totalorder %s38_s23, 0 }
   0xf   : > { %p839_p8 = por %p57_p5, %p56_p3  ;;  %p144_p10 = scmp.eq.s32.totalorder %s522_s19, 1 }
  0x10   : > { %p843_p9 = por %p138_p6, %p50_p1  ;;  %p561_p13 = scmp.lt.s32.totalorder %s766_s17, 2 }
  0x11   : > { %s1039_s24 = scalar_select %p839_p8, 1, 0 }
  0x12   : > { %s1040_s25 = scalar_select %p843_p9, 1, 0 }
  0x13   : > { %s848_s26 = scalar_select %p41_p7, %s754_s14, %s43_s21  }
  0x14   : > { %p850_p11 = por %p144_p10, %p56_p3  ;;  %s857_s28 = sand.u32 1, %s754_s14  }
  0x15   : > { %s525_s29 = sshll.u32 %s857_s28, 3  ;;  %s541_s30 = sshll.u32 %s762_s16, 7 }
  0x16   : > { %s1041_s27 = scalar_select %p850_p11, 1, 0 }
  0x17   : > { %s866_s6 = scalar_lea.hbm %s1032_s0, %s541_s30  ;;  %s168_s7 = scalar_lea.vmem [#allocation2], %s525_s29 }
  0x18   : > { %s178_s8 = sshll.u32 %s168_s7, 4  ;;  %p874_p0 = pnand %p561_p13, %p833_p4  ;;  %s870_s8 = int_to_ptr.vmem [resolvable:$true] %s178_s8 }
  0x19   : > { %s165_s10 = scalar_lea.sflag [#allocation3], %s857_s28  ;;  %s620_s11 = scalar_lea.hbm %s866_s6, 128 }
  0x1a   : > { %p621_p3 = scmp.ne.s32.totalorder %s866_s6, %s620_s11  ;;  %p622_p5 = pneg %p874_p0 }
  0x1b   : > { %s625_s21 = scalar_lea.hbm %s1032_s0, 256  ;;  %p626_p4 = scmp.lt.u32.totalorder %s866_s6, %s1032_s0 }
  0x1c   : > { %p623_p6 = pnand %p622_p5, %p621_p3  ;;  %p627_p10 = scmp.lt.u32.totalorder %s625_s21, %s620_s11 }
  0x1d   : > { %p629_p12 = scmp.lt.u32.totalorder %s620_s11, %s866_s6 }
  0x1e   : > { %p624_p7 = pneg %p623_p6  ;;  %p628_p13 = por %p627_p10, %p626_p4 }
  0x20   : > { %p630_p1 = por %p629_p12, %p628_p13 }
  0x22   : > { %p631_p2 = pnand %p630_p1, %p624_p7 }
  0x24   : > { %634 = shalt.err (!%p631_p2)
}
  0x25   : > { %s635_s4 = scalar_lea.vmem %s870_s8, 128  ;;  %s768_s5 = smov [#allocation2]  }
  0x26   : > { %p636_p3 = scmp.ne.s32.totalorder %s870_s8, %s635_s4  ;;  %s640_s7 = sshll.u32 %s768_s5, 4  ;;  %s641_s7 = int_to_ptr.vmem [resolvable:$false] %s640_s7 }
  0x27   : > { %s642_s18 = scalar_lea.vmem %s641_s7, 256  ;;  %p643_p9 = scmp.lt.s32.totalorder %s870_s8, %s641_s7 }
  0x28   : > { %p638_p6 = pnand %p636_p3, %p622_p5  ;;  %p644_p4 = scmp.lt.s32.totalorder %s642_s18, %s635_s4 }
  0x2a   : > { %p639_p11 = pneg %p638_p6  ;;  %p645_p10 = por %p644_p4, %p643_p9 }
  0x2c   : > { %p646_p12 = pnand %p645_p10, %p639_p11 }
  0x2e   : > { %649 = shalt.err (!%p646_p12)
}
  0x2f   : > { %553 = dma.hbm_to_vmem [thread:$0]  (!%p874_p0), %s866_s6, 128, %s870_s8, %s165_s10  }
  0x30   : > { %p1043_p1 = scmp.lt.s32.totalorder %s766_s17, 3  ;;  %p1044_p2 = scmp.ge.s32.totalorder %s766_s17, 1 }
  0x31   : > { %s919_s22 = scalar_lea.hbm %s1033_s1, %s541_s30  ;;  %s189_s23 = scalar_lea.vmem [#allocation5], %s525_s29 }
  0x32   : > { %p910_p7 = pnand %p1044_p2, %p1043_p1  ;;  %s199_s4 = sshll.u32 %s189_s23, 4  ;;  %s200_s4 = int_to_ptr.vmem [resolvable:$true] %s199_s4 }
  0x33   : > { %s186_s6 = scalar_lea.sflag [#allocation6], %s857_s28  ;;  %s650_s8 = scalar_lea.hbm %s919_s22, 128 }
  0x34   : > { %s1045_s11 = scalar_select %p910_p7, 1, 0 }
  0x35   : > { %p651_p9 = scmp.ne.s32.totalorder %s919_s22, %s650_s8  ;;  %s655_s30 = scalar_lea.hbm %s1033_s1, 256 }
  0x36   : > { %p656_p3 = scmp.lt.u32.totalorder %s919_s22, %s1033_s1  ;;  %p657_p6 = scmp.lt.u32.totalorder %s655_s30, %s650_s8 }
  0x37   : > { %p653_p11 = pnand %p651_p9, %p622_p5  ;;  %p659_p10 = scmp.lt.u32.totalorder %s650_s8, %s919_s22 }
  0x38   : > { %p658_p4 = por %p657_p6, %p656_p3 }
  0x39   : > { %p654_p13 = pneg %p653_p11 }
  0x3a   : > { %p660_p12 = por %p659_p10, %p658_p4 }
  0x3c   : > { %p661_p1 = pnand %p660_p12, %p654_p13 }
  0x3e   : > { %664 = shalt.err (!%p661_p1)
}
  0x3f   : > { %s665_s28 = scalar_lea.vmem %s200_s4, 128  ;;  %s769_s29 = smov [#allocation5]  }
  0x40   : > { %p666_p2 = scmp.ne.s32.totalorder %s200_s4, %s665_s28  ;;  %s670_s19 = sshll.u32 %s769_s29, 4  ;;  %s671_s19 = int_to_ptr.vmem [resolvable:$false] %s670_s19 }
  0x41   : > { %s672_s21 = scalar_lea.vmem %s671_s19, 256  ;;  %p673_p8 = scmp.lt.s32.totalorder %s200_s4, %s671_s19 }
  0x42   : > { %p668_p9 = pnand %p666_p2, %p622_p5  ;;  %p674_p7 = scmp.lt.s32.totalorder %s672_s21, %s665_s28 }
  0x44   : > { %p669_p11 = pneg %p668_p9  ;;  %p675_p3 = por %p674_p7, %p673_p8 }
  0x46   : > { %p676_p6 = pnand %p675_p3, %p669_p11 }
  0x48   : > { %679 = shalt.err (!%p676_p6)
}
  0x49   : > { %556 = dma.hbm_to_vmem [thread:$0]  (!%p874_p0), %s919_s22, 128, %s200_s4, %s186_s6  }
  0x4a   : > { %p1046_p13 = scmp.ne.s32.totalorder %s1045_s11, 0 }
  0x4b   : > { %s946_s23 = sand.u32 (!%p1046_p13), 1, %s750_s13   ;;  %p1047_p8 = scmp.ne.s32.totalorder (!%p1046_p13), %s1039_s24, 0 }
  0x4c   : > { %220 = sbr.rel (%p1046_p13) target bundleno = 153 (0x99), region = 32  ;;  %s949_s8 = sshll.u32 (!%p1046_p13), %s946_s23, 3 }
  0x4d   : > { %s223_s10 = scalar_lea.sflag (!%p1046_p13), [#allocation3], %s946_s23  ;;  %s226_s5 = scalar_lea.vmem (!%p1046_p13), [#allocation2], %s949_s8 }
  0x53   : > { %733 = dma.done.wait (%p1047_p8), %s223_s10, 128  }
  0x54   : > { %735 = vsyncadd (%p1047_p8), %s223_s10, 4294967168  ;;  %s232_s9 = scalar_lea.sflag [#allocation6], %s946_s23  ;;  %s235_s11 = scalar_lea.vmem [#allocation5], %s949_s8 }
  0x55   : > { %737 = dma.done.wait (%p1047_p8), %s232_s9, 128  }
  0x56   : > { %739 = vsyncadd (%p1047_p8), %s232_s9, 4294967168  ;;  %v963_v0 = vld [vmem:[%s226_s5] sm:$0xff]  ;;  %v965_v1 = vld [vmem:[%s235_s11] sm:$0xff]  ;;  %vm291_vm0 = vcmask 1043456   ;;  %p274_p0 = scmp.lt.s32.totalorder %s758_s15, 1  ;;  %v352_v42 = vlaneseq  ;;  %s270_s7 = scalar_lea.vmem [#allocation7], %s949_s8 }
  0x57   : > { %v287_v2 = vmul.f32 %v963_v0, %v963_v0  ;;  %v306_v3 = vmul.f32 %v965_v1, %v965_v1  ;;  %v770_v40 = vmov 1966171168   ;;  %s396_s18 = sshll.u32 %s270_s7, 4  ;;  %s543_s28 = sshll.u32 %s758_s15, 7  ;;  %s980_s18 = int_to_ptr.vmem [resolvable:$true] %s396_s18 }
  0x58   : > { %s275_s24 = scalar_select %p274_p0, %s758_s15, 1  ;;  %v350_v41 = vunpack.c.l.s4 %v770_v40  ;;  %v353_v52 = vshrl.u32 %v352_v42, 7 }
  0x59   : > { %v289_v4 = vcombine.high %v287_v2, %v287_v2  ;;  %v292_v5 = vsel %vm291_vm0, %v287_v2, 0.0  ;;  %v308_v6 = vcombine.high %v306_v3, %v306_v3  ;;  %v310_v7 = vsel %vm291_vm0, %v306_v3, 0.0  ;;  %s985_s21 = scalar_lea.hbm %s1035_s3, %s543_s28  ;;  %s380_s10 = scalar_lea.sflag [#allocation4], %s946_s23 }
  0x5a   : > { %v293_v8 = vrot.slane %v292_v5, 4  ;;  %v311_v9 = vrot.slane %v310_v7, 4  ;;  %s535_s22 = sshll.u32 %s275_s24, 1  ;;  %v351_v51 = vunpack.c.0.s8 %v350_v41  ;;  %v368_v61 = vsub.s32 0, %v353_v52  ;;  %s680_s5 = scalar_lea.vmem %s980_s18, 128 }
  0x5b   : > { %v299_v10 = vsel %vm291_vm0, %v289_v4, 0.0  ;;  %v317_v11 = vsel %vm291_vm0, %v308_v6, 0.0  ;;  %s280_s30 = scalar_lea.vmem %s1034_s2, %s535_s22  ;;  %v372_v62 = vsub.s32 1, %v353_v52  ;;  %p681_p5 = scmp.ne.s32.totalorder %s980_s18, %s680_s5 }
  0x5c   : > { %v294_v12 = vadd.f32 %v293_v8, %v292_v5  ;;  %v300_v13 = vrot.slane %v299_v10, 4  ;;  %v312_v14 = vadd.f32 %v311_v9, %v310_v7  ;;  %v318_v15 = vrot.slane %v317_v11, 4  ;;  %v283_v58 = vld [vmem:[%s280_s30] sm:$0x3]  ;;  %p1048_p7 = scmp.ne.s32.totalorder %s1040_s25, 0  ;;  %s771_s15 = smov [#allocation7]  }
  0x5d   : > { %v354_v57 = vsub.s32 %v351_v51, %v353_v52  ;;  %vm284_vm5 = vcmp.lt.f32.partialorder %v283_v58, 0.25  ;;  %s684_s8 = sshll.u32 %s771_s15, 4  ;;  %s685_s8 = int_to_ptr.vmem [resolvable:$false] %s684_s8 }
  0x5e   : > { %v295_v16 = vrot.slane %v294_v12, 2  ;;  %v301_v17 = vadd.f32 %v300_v13, %v299_v10  ;;  %v313_v18 = vrot.slane %v312_v14, 2  ;;  %v319_v19 = vadd.f32 %v318_v15, %v317_v11  ;;  %p682_p4 = pnand %p681_p5, %p1048_p7  ;;  %s686_s9 = scalar_lea.vmem %s685_s8, 256 }
  0x5f   : > { %p687_p12 = scmp.lt.s32.totalorder %s980_s18, %s685_s8  ;;  %p688_p1 = scmp.lt.s32.totalorder %s686_s9, %s680_s5 }
  0x60   : > { %v296_v20 = vadd.f32 %v295_v16, %v294_v12  ;;  %v302_v21 = vrot.slane %v301_v17, 2  ;;  %v314_v22 = vadd.f32 %v313_v18, %v312_v14  ;;  %v320_v23 = vrot.slane %v319_v19, 2  ;;  %p683_p10 = pneg %p682_p4 }
  0x61   : > { %p689_p2 = por %p688_p1, %p687_p12 }
  0x62   : > { %v297_v24 = vrot.slane %v296_v20, 1  ;;  %v303_v25 = vadd.f32 %v302_v21, %v301_v17  ;;  %v315_v26 = vrot.slane %v314_v22, 1  ;;  %v321_v27 = vadd.f32 %v320_v23, %v319_v19 }
  0x63   : > { %p690_p9 = pnand %p689_p2, %p683_p10 }
  0x64   : > { %v298_v28 = vadd.f32 %v297_v24, %v296_v20  ;;  %v304_v29 = vrot.slane %v303_v25, 1  ;;  %v316_v30 = vadd.f32 %v315_v26, %v314_v22  ;;  %v322_v31 = vrot.slane %v321_v27, 1 }
  0x66   : > { %v305_v32 = vadd.f32 %v304_v29, %v303_v25  ;;  %v323_v33 = vadd.f32 %v322_v31, %v321_v27  ;;  %v324_v34 = vmax.f32 %v316_v30, 1e-24  ;;  %612 = vrsqrt.f32 %v298_v28 }
  0x67   : > { %vm330_vm1 = vcmp.eq.f32.partialorder %v298_v28, inf  ;;  %v333_v37 = vand.u32 2147483648, %v298_v28  ;;  %vm332_vm2 = vcmp.eq.f32.partialorder %v298_v28, 0.0 }
  0x68   : > { %v325_v35 = vmax.f32 %v323_v33, 1e-24  ;;  %614 = vrsqrt.f32 %v324_v34  ;;  %vm337_vm3 = vcmp.eq.f32.partialorder %v305_v32, inf  ;;  %v340_v45 = vand.u32 2147483648, %v305_v32 }
  0x69   : > { %616 = vrsqrt.f32 %v305_v32  ;;  %vm339_vm4 = vcmp.eq.f32.partialorder %v305_v32, 0.0 }
  0x6a   : > { %618 = vrsqrt.f32 %v325_v35 }
  0x70   : > { %v613_v36 = vpop.eup %612 }
  0x71   : > { %v329_v38 = vmul.f32 %v613_v36, %v298_v28 }
  0x72   : > { %v615_v39 = vpop.eup %614 }
  0x73   : > { %v617_v43 = vpop.eup %616  ;;  %v331_v44 = vsel %vm330_vm1, %v298_v28, %v329_v38 }
  0x74   : > { %v334_v46 = vsel %vm332_vm2, %v333_v37, %v331_v44  ;;  %v336_v47 = vmul.f32 %v617_v43, %v305_v32  ;;  %v619_v48 = vpop.eup %618 }
  0x75   : > { %v342_v49 = vmul.f32 %v615_v39, %v334_v46 }
  0x76   : > { %v338_v50 = vsel %vm337_vm3, %v305_v32, %v336_v47 }
  0x77   : > { %v341_v53 = vsel %vm339_vm4, %v340_v45, %v338_v50  ;;  %v344_v55 = vmul.f32 0.25, %v342_v49 }
  0x78   : > { %v343_v54 = vmul.f32 %v619_v48, %v341_v53 }
  0x7a   : > { %v345_v56 = vmul.f32 0.25, %v343_v54 }
  0x7c   : > { %v348_v59 = vcombine.low %v344_v55, %v345_v56 }
  0x7e   : > { %v355_v60 = vrot.slane %v348_v59, %v354_v57 }
  0x80   : > { %v362_v63 = vrot.slane %v355_v60, %v354_v57 }
  0x82   : > { %v364_v2 = vsel %vm284_vm5, %v362_v63, 0.0 }
  0x83   : > { %v369_v3 = vrot.slane %v364_v2, %v368_v61  ;;  %v373_v4 = vrot.slane %v364_v2, %v372_v62 }
  0x85   : > { %v374_v5 = vcombine.low %v369_v3, %v373_v4 }
  0x87   : > { %v376_v6 = vmul.f32 %v374_v5, %v965_v1 }
  0x89   : > { %v377_v7 = vadd.f32 %v376_v6, %v963_v0 }
  0x8b   : > { %378 = vst [vmem:[%s270_s7] sm:$0xff] %v377_v7 }
  0x8c   : > { %693 = shalt.err (!%p690_p9)
}
  0x8d   : > { %s694_s23 = scalar_lea.hbm %s985_s21, 128  ;;  %s698_s22 = scalar_lea.hbm %s1035_s3, 256 }
  0x8e   : > { %p695_p11 = scmp.ne.s32.totalorder %s985_s21, %s694_s23  ;;  %p699_p13 = scmp.lt.u32.totalorder %s985_s21, %s1035_s3 }
  0x8f   : > { %p700_p8 = scmp.lt.u32.totalorder %s698_s22, %s694_s23  ;;  %p702_p5 = scmp.lt.u32.totalorder %s694_s23, %s985_s21 }
  0x90   : > { %p696_p3 = pnand %p695_p11, %p1048_p7 }
  0x91   : > { %p701_p0 = por %p700_p8, %p699_p13 }
  0x92   : > { %p697_p6 = pneg %p696_p3 }
  0x93   : > { %p703_p4 = por %p702_p5, %p701_p0 }
  0x95   : > { %p704_p10 = pnand %p703_p4, %p697_p6 }
  0x97   : > { %707 = shalt.err (!%p704_p10)
}
  0x98   : > { %548 = dma.vmem_to_hbm [thread:$0]  (%p1048_p7), %s980_s18, 128, %s985_s21, %s380_s10  }
  0x99 PF: > { %s408_s30 = sand.u32 1, %s746_s12   ;;  %p1049_p12 = scmp.ne.s32.totalorder %s1041_s27, 0 }
  0x9a   : > { %p1050_p1 = scmp.ge.s32.totalorder %s766_s17, 2  ;;  %s409_s7 = scalar_lea.sflag [#allocation4], %s408_s30 }
  0x9c   : > { %p558_p2 = pnand %p1050_p1, %p1049_p12 }
  0x9e   : > { %741 = dma.done.wait (!%p558_p2), %s409_s7, 128  }
  0x9f   : > { %743 = vsyncadd (!%p558_p2), %s409_s7, 4294967168  ;;  %s22_s17 = sadd.s32 1, %s766_s17   ;;  %s1051_s12 = smov %s750_s13 }
  0xa0   : > { %p19_p9 = scmp.ge.s32.totalorder %s22_s17, 4   ;;  %s1052_s13 = smov %s754_s14 }
  0xa1   : > { %s1053_s14 = smov %s848_s26  ;;  %s1054_s15 = smov %s762_s16 }
  0xa2   : > { %s1055_s16 = smov %s1057_s20  ;;  %21 = sbr.rel (!%p19_p9) target bundleno = 8 (0x8), region = 93 }
  0xa9   :  { %414 = vsyncpa [#allocation3], 1 }
  0xaa   :  { %416 = vsyncpa [#allocation3 + $0x1], 1 }
  0xab   :  { %417 = vsyncpa [#allocation6], 1 }
  0xac   :  { %419 = vsyncpa [#allocation6 + $0x1], 1 }
  0xad   :  { %420 = vsyncpa [#allocation4], 1 }
  0xae   :  { %422 = vsyncpa [#allocation4 + $0x1], 1 }

</bundles_post_ra>
